<compile_context>
chip_gen: v7x
topology: tpu7x:2x2x1
jax: 0.10.0
libtpu: 0.0.40
codegen_flags: <defaults>
</compile_context>

<pallas_src>
import functools
import math

import jax
import jax.numpy as jnp
from jax.experimental import pallas as pl
from jax.experimental.pallas import tpu as pltpu


def _layernorm(x, w, b, eps=1e-5):
    # Single sweep: mean and E[x^2] together; var = E[x^2] - mean^2 (clamped).
    mu = jnp.mean(x, axis=-1, keepdims=True)
    mu2 = jnp.mean(x * x, axis=-1, keepdims=True)
    var = jnp.maximum(mu2 - mu * mu, 0.0)
    return (x - mu) * jax.lax.rsqrt(var + eps) * w + b


# ---------------------------------------------------------------------------
# Pass 1: fused k/v projection.  One (tl, C) @ (C, 2C) bf16 matmul per token
# tile; the f32 result is sliced (lane-aligned since C % 128 == 0 in practice)
# and stored as bf16 k / v.
# ---------------------------------------------------------------------------
def _kv_proj_kernel(tgt_ref, wkv_ref, k_ref, v_ref):
    tgt = tgt_ref[...].astype(jnp.bfloat16)
    kv = jnp.dot(tgt, wkv_ref[...], preferred_element_type=jnp.float32)
    c = k_ref.shape[-1]
    k_ref[...] = kv[:, :c].astype(k_ref.dtype)
    v_ref[...] = kv[:, c:].astype(v_ref.dtype)


# ---------------------------------------------------------------------------
# Pass 2: q projection (kv==0), flash attention (online softmax over KV
# tiles), then on the last KV step: merge proj + LN1, FFN as a split matmul
# (no concat) + LN2, residual add.
# ---------------------------------------------------------------------------
def _attn_ffn_kernel(src_ref, k_ref, v_ref,
                     wq_ref, wm_ref, ln1_w_ref, ln1_b_ref,
                     w1s_ref, w1m_ref, w2_ref,
                     ln2_w_ref, ln2_b_ref,
                     out_ref,
                     q_sc, m_sc, l_sc, acc_sc, *, scale):
    kv = pl.program_id(2)

    @pl.when(kv == 0)
    def _():
        # q projection fused here: the source tile is already resident.
        src = src_ref[...].astype(jnp.bfloat16)
        q = jnp.dot(src, wq_ref[...], preferred_element_type=jnp.float32)
        q_sc[...] = (q * scale).astype(q_sc.dtype)      # 1/sqrt(C) folded in
        m_sc[...] = jnp.full_like(m_sc, -jnp.inf)
        l_sc[...] = jnp.zeros_like(l_sc)
        acc_sc[...] = jnp.zeros_like(acc_sc)

    # (tq, tk) scores; contract the last dims directly (no k.T materialized).
    s = jax.lax.dot_general(q_sc[...], k_ref[...],
                            (((1,), (1,)), ((), ())),
                            preferred_element_type=jnp.float32)

    m_prev = m_sc[...]
    m_new = jnp.maximum(m_prev, jnp.max(s, axis=-1, keepdims=True))
    alpha = jnp.exp(m_prev - m_new)
    p = jnp.exp(s - m_new)
    l_sc[...] = alpha * l_sc[...] + jnp.sum(p, axis=-1, keepdims=True)
    acc_sc[...] = alpha * acc_sc[...] + jnp.dot(
        p.astype(v_ref.dtype), v_ref[...], preferred_element_type=jnp.float32)
    m_sc[...] = m_new

    @pl.when(kv == pl.num_programs(2) - 1)
    def _():
        inv_l = pl.reciprocal(l_sc[...], approx=True)          # EUP slot
        message = acc_sc[...] * inv_l                          # (tq, C) f32

        # merge projection + LayerNorm1 (LN math in f32)
        message = jnp.dot(message.astype(jnp.bfloat16), wm_ref[...],
                          preferred_element_type=jnp.float32)
        message = _layernorm(message, ln1_w_ref[...], ln1_b_ref[...])

        # FFN on concat([source, message]) == src @ W1[:C] + msg @ W1[C:]
        src = src_ref[...]
        h = (jnp.dot(src.astype(jnp.bfloat16), w1s_ref[...],
                     preferred_element_type=jnp.float32)
             + jnp.dot(message.astype(jnp.bfloat16), w1m_ref[...],
                       preferred_element_type=jnp.float32))
        h = jax.nn.gelu(h, approximate=False)   # exact GELU = nn.GELU default
        message = jnp.dot(h.astype(jnp.bfloat16), w2_ref[...],
                          preferred_element_type=jnp.float32)
        message = _layernorm(message, ln2_w_ref[...], ln2_b_ref[...])

        out_ref[...] = (src + message).astype(out_ref.dtype)


def _tpu_vmem_capacity_bytes():
    try:
        return int(pltpu.get_tpu_info().vmem_capacity_bytes)
    except Exception:
        return 128 * 1024 * 1024   # conservative fallback (v5e/v6e)


def _pick_tile(length, cap, multiple=16):
    """Largest divisor of `length` that is <= cap and a multiple of `multiple`
    (sublane-safe for bf16/f32); falls back to the full extent, which is
    always a legal block shape."""
    if length <= cap:
        return length
    t = (cap // multiple) * multiple
    while t >= multiple:
        if length % t == 0:
            return t
        t -= multiple
    return length


def transformer_layer(source, target, params, *, tq=None, tk=None, tl=None):
    """source, target: [B, L, C] float32.  params: dict of weights."""
    B, L, C = source.shape
    hidden = params["w1"].shape[1]
    bf16 = jnp.bfloat16

    # Generation-aware sizing: v5e/v6e have 128 MiB VMEM, v7x has 64 MiB.
    vmem_cap = _tpu_vmem_capacity_bytes()
    big_vmem = vmem_cap >= 100 * (1 << 20)
    # v6e/v7x MXU is 2x256x256: keep tiles 256-aligned; tq > tk bounds the
    # (tq, tk) f32 temporaries while amortizing the heavy FFN epilogue.
    tq = tq or _pick_tile(L, 512 if big_vmem else 256)
    tk = tk or _pick_tile(L, 256)
    tl = tl or _pick_tile(L, 256)
    assert L % tq == 0 and L % tk == 0 and L % tl == 0, "tiles must divide L"
    vmem_limit = int(min(vmem_cap, 128 << 20)) * 3 // 4   # ~96 MiB / ~48 MiB

    # bf16 weights feed the MXU natively; LayerNorm params stay f32.
    wq = params["wq"].astype(bf16)
    wkv = jnp.concatenate([params["wk"], params["wv"]], axis=1).astype(bf16)
    wm = params["wm"].astype(bf16)
    w1_src = params["w1"][:C].astype(bf16)   # split of the concat matmul
    w1_msg = params["w1"][C:].astype(bf16)
    w2 = params["w2"].astype(bf16)

    scale = 1.0 / math.sqrt(C)

    # --- pass 1: k/v projections (single fused matmul per token tile) -------
    tok1 = pl.BlockSpec((None, tl, C), lambda b, i: (b, i, 0))
    k, v = pl.pallas_call(
        _kv_proj_kernel,
        out_shape=(jax.ShapeDtypeStruct((B, L, C), bf16),) * 2,
        grid_spec=pltpu.PrefetchScalarGridSpec(
            num_scalar_prefetch=0,
            grid=(B, L // tl),
            in_specs=[tok1,
                      pl.BlockSpec((C, 2 * C), lambda b, i: (0, 0))],
            out_specs=(tok1, tok1),
        ),
        compiler_params=pltpu.CompilerParams(
            dimension_semantics=("parallel", "parallel"),
            vmem_limit_bytes=vmem_limit),
    )(target, wkv)

    # --- pass 2: q proj + flash attention + merge/LN1 + FFN/LN2 + residual --
    qtok = pl.BlockSpec((None, tq, C), lambda b, qi, ki: (b, qi, 0))
    ktok = pl.BlockSpec((None, tk, C), lambda b, qi, ki: (b, ki, 0))

    # NOTE: these weight blocks have constant index maps (fetched once); on a
    # VMEM-tight v7x config they could additionally be single-buffered via
    # pipeline_mode, left at the default here for portability.
    def full2(shp):
        return pl.BlockSpec(shp, lambda b, qi, ki: (0,) * len(shp))

    return pl.pallas_call(
        functools.partial(_attn_ffn_kernel, scale=scale),
        out_shape=jax.ShapeDtypeStruct((B, L, C), source.dtype),
        grid_spec=pltpu.PrefetchScalarGridSpec(
            num_scalar_prefetch=0,
            grid=(B, L // tq, L // tk),
            in_specs=[
                qtok,                     # source (q proj / FFN / residual)
                ktok,                     # k (bf16)
                ktok,                     # v (bf16)
                full2((C, C)),            # q projection weight
                full2((C, C)),            # merge weight
                full2((1, C)), full2((1, C)),              # LayerNorm1 w, b
                full2((C, hidden)), full2((C, hidden)),    # W1 split (src, msg)
                full2((hidden, C)),                        # W2
                full2((1, C)), full2((1, C)),              # LayerNorm2 w, b
            ],
            out_specs=qtok,
            scratch_shapes=[
                pltpu.VMEM((tq, C), bf16),          # projected, pre-scaled q
                pltpu.VMEM((tq, 1), jnp.float32),   # running max
                pltpu.VMEM((tq, 1), jnp.float32),   # running denom
                pltpu.VMEM((tq, C), jnp.float32),   # output accumulator
            ]),
        compiler_params=pltpu.CompilerParams(
            dimension_semantics=("parallel", "parallel", "arbitrary"),
            vmem_limit_bytes=vmem_limit),
    )(source, k, v,
      wq, wm, params["ln1_w"], params["ln1_b"],
      w1_src, w1_msg, w2,
      params["ln2_w"], params["ln2_b"])


def init_params(key, d_model, ffn_dim_expansion=4):
    """Deterministic synthetic parameters; Linear weights stored as [in, out]."""
    ks = jax.random.split(key, 6)
    C = d_model
    hidden = 2 * C * ffn_dim_expansion

    def lin(k, fan_in, fan_out):
        bound = 1.0 / math.sqrt(fan_in)
        # equivalent of (nn.Linear weight [out,in]).T -> [in, out]
        return jax.random.uniform(k, (fan_in, fan_out), jnp.float32, -bound, bound)

    return {
        "wq": lin(ks[0], C, C),
        "wk": lin(ks[1], C, C),
        "wv": lin(ks[2], C, C),
        "wm": lin(ks[3], C, C),
        "ln1_w": jnp.ones((1, C), jnp.float32),
        "ln1_b": jnp.zeros((1, C), jnp.float32),
        "w1": lin(ks[4], 2 * C, hidden),
        "w2": lin(ks[5], hidden, C),
        "ln2_w": jnp.ones((1, C), jnp.float32),
        "ln2_b": jnp.zeros((1, C), jnp.float32),
    }


def reference_forward(source, target, p):
    """Pure-JAX f32 reference of the PyTorch forward (full-attention path)."""
    q = source @ p["wq"]
    k = target @ p["wk"]
    v = target @ p["wv"]
    scores = jnp.einsum("blc,bmc->blm", q, k) / math.sqrt(q.shape[-1])
    attn = jax.nn.softmax(scores, axis=-1)
    msg = jnp.einsum("blm,bmc->blc", attn, v) @ p["wm"]
    msg = _layernorm(msg, p["ln1_w"][0], p["ln1_b"][0])
    cat = jnp.concatenate([source, msg], axis=-1)
    h = jax.nn.gelu(cat @ p["w1"], approximate=False)
    msg = _layernorm(h @ p["w2"], p["ln2_w"][0], p["ln2_b"][0])
    return source + msg


if __name__ == "__main__":
    # Lane-dense channel dim (multiple of 128); seq = H*W = 512 tokens so that
    # 256-aligned tq/tk exercise both multiple q tiles and the online-softmax
    # kv loop (grid = (2, 2, 2)).
    B, H, W, C = 2, 16, 32, 128
    L = H * W
    key = jax.random.PRNGKey(0)
    k_src, k_tgt, k_par = jax.random.split(key, 3)

    source = jax.random.normal(k_src, (B, L, C), jnp.float32)
    target = jax.random.normal(k_tgt, (B, L, C), jnp.float32)
    params = init_params(k_par, C)

    out = transformer_layer(source, target, params, tq=256, tk=256, tl=256)
    out = jax.block_until_ready(out)

    ref = jax.block_until_ready(reference_forward(source, target, params))
    assert out.shape == (B, L, C)
    assert bool(jnp.all(jnp.isfinite(out)))
    max_err = float(jnp.max(jnp.abs(out - ref)))
    mean_err = float(jnp.mean(jnp.abs(out - ref)))
    # bf16 matmul inputs with f32 accumulation vs. a pure-f32 reference
    assert max_err < 1e-1, f"mismatch vs f32 reference: max abs err {max_err}"
    assert mean_err < 1e-2, f"mismatch vs f32 reference: mean abs err {mean_err}"

    print("KERNEL_OK")
</pallas_src>

<mosaic_0001>
module attributes {stable_mosaic.version = 11 : i64} {
  func.func @_kv_proj_kernel(%arg0: i32, %arg1: i32, %arg2: memref<1x256x128xf32, #tpu.memory_space<vmem>>, %arg3: memref<128x256xbf16, #tpu.memory_space<vmem>>, %arg4: memref<1x256x128xbf16, #tpu.memory_space<vmem>>, %arg5: memref<1x256x128xbf16, #tpu.memory_space<vmem>>) attributes {dimension_semantics = [#tpu.dimension_semantics<parallel>, #tpu.dimension_semantics<parallel>], iteration_bounds = array<i64: 2, 2>, scalar_prefetch = 0 : i64, scratch_operands = 0 : i64, tpu.core_type = #tpu.core_type<tc>, window_params = [{transform_indices = @transform_0, window_bounds = array<i64: 1, 256, 128>}, {pipeline_mode = #tpu.pipeline_mode<synchronous>, transform_indices = @transform_1, window_bounds = array<i64: 128, 256>}, {transform_indices = @transform_2, window_bounds = array<i64: 1, 256, 128>}, {transform_indices = @transform_3, window_bounds = array<i64: 1, 256, 128>}]} {
    %c0 = arith.constant 0 : index
    %c0_0 = arith.constant 0 : index
    %c0_1 = arith.constant 0 : index
    %0 = vector.load %arg2[%c0, %c0_0, %c0_1] : memref<1x256x128xf32, #tpu.memory_space<vmem>>, vector<1x256x128xf32>
    %1 = vector.shape_cast %0 : vector<1x256x128xf32> to vector<256x128xf32>
    %2 = arith.truncf %1 : vector<256x128xf32> to vector<256x128xbf16>
    %c0_2 = arith.constant 0 : index
    %c0_3 = arith.constant 0 : index
    %3 = vector.load %arg3[%c0_2, %c0_3] : memref<128x256xbf16, #tpu.memory_space<vmem>>, vector<128x256xbf16>
    %cst = arith.constant dense<0.000000e+00> : vector<256x256xf32>
    %4 = tpu.matmul %2, %3, %cst {dimension_numbers = #tpu.dot_dimension_numbers<[1], [0], [0], [1], [0, 0, 1, 1], [], []>} : vector<256x128xbf16>, vector<128x256xbf16>, vector<256x256xf32> -> vector<256x256xf32>
    %5 = vector.extract_strided_slice %4 {offsets = [0, 0], sizes = [256, 128], strides = [1, 1]} : vector<256x256xf32> to vector<256x128xf32>
    %6 = arith.truncf %5 : vector<256x128xf32> to vector<256x128xbf16>
    %c0_4 = arith.constant 0 : index
    %c0_5 = arith.constant 0 : index
    %c0_6 = arith.constant 0 : index
    %7 = vector.load %arg4[%c0_4, %c0_5, %c0_6] : memref<1x256x128xbf16, #tpu.memory_space<vmem>>, vector<1x256x128xbf16>
    %8 = vector.shape_cast %7 : vector<1x256x128xbf16> to vector<256x128xbf16>
    %9 = vector.shape_cast %6 : vector<256x128xbf16> to vector<1x256x128xbf16>
    tpu.vector_store %arg4[%c0_4, %c0_5, %c0_6], %9 {strides = array<i32>} : memref<1x256x128xbf16, #tpu.memory_space<vmem>>, vector<1x256x128xbf16>,
    %10 = vector.extract_strided_slice %4 {offsets = [0, 128], sizes = [256, 128], strides = [1, 1]} : vector<256x256xf32> to vector<256x128xf32>
    %11 = arith.truncf %10 : vector<256x128xf32> to vector<256x128xbf16>
    %c0_7 = arith.constant 0 : index
    %c0_8 = arith.constant 0 : index
    %c0_9 = arith.constant 0 : index
    %12 = vector.load %arg5[%c0_7, %c0_8, %c0_9] : memref<1x256x128xbf16, #tpu.memory_space<vmem>>, vector<1x256x128xbf16>
    %13 = vector.shape_cast %12 : vector<1x256x128xbf16> to vector<256x128xbf16>
    %14 = vector.shape_cast %11 : vector<256x128xbf16> to vector<1x256x128xbf16>
    tpu.vector_store %arg5[%c0_7, %c0_8, %c0_9], %14 {strides = array<i32>} : memref<1x256x128xbf16, #tpu.memory_space<vmem>>, vector<1x256x128xbf16>,
    return
  }
  func.func @transform_0(%arg0: i32, %arg1: i32) -> (i32, i32, i32) {
    %c0_i32 = arith.constant 0 : i32
    %c0_i32_0 = arith.constant 0 : i32
    return %arg0, %arg1, %c0_i32 : i32, i32, i32
  }
  func.func @transform_1(%arg0: i32, %arg1: i32) -> (i32, i32) {
    %c0_i32 = arith.constant 0 : i32
    %c0_i32_0 = arith.constant 0 : i32
    %c0_i32_1 = arith.constant 0 : i32
    return %c0_i32, %c0_i32_0 : i32, i32
  }
  func.func @transform_2(%arg0: i32, %arg1: i32) -> (i32, i32, i32) {
    %c0_i32 = arith.constant 0 : i32
    %c0_i32_0 = arith.constant 0 : i32
    return %arg0, %arg1, %c0_i32 : i32, i32, i32
  }
  func.func @transform_3(%arg0: i32, %arg1: i32) -> (i32, i32, i32) {
    %c0_i32 = arith.constant 0 : i32
    %c0_i32_0 = arith.constant 0 : i32
    return %arg0, %arg1, %c0_i32 : i32, i32, i32
  }
}

</mosaic_0001>

<bundles_post_ra>
// kernel: tpu_custom_call.1
= control target key start
LH: loop header
LB: loop body
LE: loop exit
PB: predicated region body
PF: predicated region fallthrough
CT: control target
= control target key end

     0   :  { %s2165_s0 = inlined_call_operand.hbm [shape: f32[2,512,128], index: 0, kind: input, shape index: {}]   ;;  %s2166_s1 = inlined_call_operand.hbm [shape: bf16[128,256], index: 1, kind: input, shape index: {}]   ;;  %s2167_s2 = inlined_call_operand.hbm [shape: bf16[2,512,128], index: 2, kind: output, shape index: {0}]   ;;  %s2168_s3 = inlined_call_operand.hbm [shape: bf16[2,512,128], index: 3, kind: output, shape index: {1}]  }
   0x1   :  { %2179 = sst [smem:[#allocation18_spill]] %s2166_s1 }
   0x2   :  { %9 = vsyncpa [#allocation3], 0 }
   0x3   :  { %11 = vsyncpa [#allocation3 + $0x1], 0 }
   0x4   :  { %12 = vsyncpa [#allocation6], 0 }
   0x5   :  { %13 = vsyncpa [#allocation4], 0 }
   0x6   :  { %15 = vsyncpa [#allocation4 + $0x1], 0 }
   0x7   :  { %16 = vsyncpa [#allocation9], 0 }
   0x8   :  { %18 = vsyncpa [#allocation9 + $0x1], 0  ;;  %s1790_s12 = smov 0   ;;  %s1792_s13 = smov 0  }
   0x9   :  { %s1794_s14 = smov 0   ;;  %s1796_s15 = smov 0  }
   0xa   :  { %s1798_s16 = smov 0   ;;  %s1800_s17 = smov 0  }
   0xb   :  { %s1802_s18 = smov 0   ;;  %s1804_s19 = smov 0  }
   0xc LB: > { %2180 = sst [smem:[#allocation14_spill]] %s1751_s17  ;;  %s1070_s20 = sadd.s32 4294967295, %s1759_s19   ;;  %s1759_s19 = sphi %s1804_s19, %s24_s19   ;;  %s1755_s18 = sphi %s1802_s18, %s2209_s18   ;;  %s1751_s17 = sphi %s1800_s17, %s2203_s17   ;;  %s1747_s16 = sphi %s1798_s16, %s2208_s16   ;;  %s1743_s15 = sphi %s1796_s15, %s2202_s15   ;;  %s1739_s14 = sphi %s1794_s14, %s2207_s14   ;;  %s1735_s13 = sphi %s1792_s13, %s2206_s13   ;;  %s1731_s12 = sphi %s1790_s12, %s2205_s12  }
   0xd   : > { %s1071_s21 = sadd.s32 4294967294, %s1759_s19   ;;  %p58_p0 = scmp.ne.s32.totalorder %s1735_s13, %s1731_s12 }
   0xe   : > { %p1834_p1 = scmp.eq.s32.totalorder %s1070_s20, 0  ;;  %p1838_p2 = scmp.eq.s32.totalorder %s1070_s20, 3 }
   0xf   : > { %p111_p3 = scmp.eq.s32.totalorder %s1071_s21, 3  ;;  %p1072_p5 = scmp.ge.s32.totalorder %s1759_s19, 1 }
  0x10   : > { %s2181_s22 = scalar_select %p1834_p1, 1, 0 }
  0x11   : > { %s2182_s23 = scalar_select %p1838_p2, 1, 0 }
  0x12   : > { %p1844_p4 = por %p1834_p1, %p58_p0  ;;  %p1849_p6 = por %p111_p3, %p58_p0 }
  0x13   : > { %p146_p7 = scmp.lt.s32.totalorder %s1759_s19, 5  ;;  %s1761_s27 = smov [#allocation5]  }
  0x14   : > { %s2183_s24 = scalar_select %p1844_p4, 1, 0 }
  0x15   : > { %s2184_s25 = scalar_select %p1849_p6, 1, 0 }
  0x16   : > { %p1854_p8 = pnand %p1072_p5, %p146_p7  ;;  %s158_s28 = sshll.u32 %s1761_s27, 4  ;;  %s159_s28 = int_to_ptr.vmem [resolvable:$true] %s158_s28 }
  0x17   : > { %2185 = sst [smem:[#allocation15_spill]] %s2184_s25  ;;  %s2188_s1 = sld [smem:[#allocation18_spill]] }
  0x18   : > { %s2186_s26 = scalar_select %p1854_p8, 1, 0 }
  0x19   : > { %p1454_p9 = pneg %p1854_p8 }
  0x1b   : > { %p1862_p10 = pnand %p1454_p9, %p1834_p1 }
  0x1d   : > { %s1567_s5 = scalar_lea.hbm %s2188_s1, 2048  ;;  %p1569_p12 = pneg %p1862_p10 }
  0x1e   : > { %p1568_p11 = scmp.ne.s32.totalorder %s2188_s1, %s1567_s5  ;;  %p1574_p3 = scmp.lt.u32.totalorder %s1567_s5, %s2188_s1 }
  0x20   : > { %p1570_p13 = pnand %p1569_p12, %p1568_p11 }
  0x22   : > { %p1571_p0 = pneg %p1570_p13 }
  0x24   : > { %p1576_p5 = pnand %p1574_p3, %p1571_p0 }
  0x26   : > { %1579 = shalt.err (!%p1576_p5)
}
  0x27   : > { %s1580_s10 = scalar_lea.vmem %s159_s28, 2048  ;;  %p1588_p1 = scmp.lt.s32.totalorder %s159_s28, %s159_s28 }
  0x28   : > { %p1581_p7 = scmp.ne.s32.totalorder %s159_s28, %s1580_s10  ;;  %p1589_p4 = scmp.lt.s32.totalorder %s1580_s10, %s1580_s10 }
  0x2a   : > { %p1583_p9 = pnand %p1581_p7, %p1569_p12  ;;  %p1590_p8 = por %p1589_p4, %p1588_p1 }
  0x2c   : > { %p1584_p6 = pneg %p1583_p9 }
  0x2e   : > { %p1591_p2 = pnand %p1590_p8, %p1584_p6 }
  0x30   : > { %1594 = shalt.err (!%p1591_p2)
}
  0x31   : > { %s2173_s11 = smov 128   ;;  %s2174_s20 = smov 8  }
  0x32   : > { %1457 = dma.hbm_to_vmem [thread:$0]  (!%p1862_p10), %s2188_s1, 2048, %s159_s28, [#allocation6], %s2173_s11, %s2173_s11, %s2174_s20  }
  0x33   : > { %s33_s30 = sadd.s32 1, %s1751_s17  ;;  %s36_s4 = sadd.s32 1, %s1755_s18 }
  0x34   : > { %p34_p1 = scmp.ge.s32.totalorder %s33_s30, 2  ;;  %s45_s5 = sadd.s32 1, %s1739_s14 }
  0x35   : > { %p52_p2 = scmp.ne.s32.totalorder %s1739_s14, %s1735_s13  ;;  %p53_p4 = scmp.eq.s32.totalorder %s1759_s19, 0 }
  0x36   : > { %s2211_s30 = smov (%p34_p1, %s33_s30), 0  ;;  %s2213_s4 = smov (!%p34_p1, %s36_s4), %s1755_s18 }
  0x37   : > { %2189 = sst [smem:[#allocation16_spill]] %s2211_s30  ;;  %s41_s29 = ssub.s32 %s1751_s17, %s2211_s30 }
  0x38   : > { %p38_p6 = scmp.ge.s32.totalorder %s2213_s4, 2  ;;  %p2190_p8 = scmp.ne.s32.totalorder %s2182_s23, 0 }
  0x39   : > { %p1902_p10 = por %p53_p4, %p52_p2  ;;  %p1470_p12 = scmp.lt.s32.totalorder %s1759_s19, 4 }
  0x3a   : > { %p1898_p11 = por %p2190_p8, %p52_p2  ;;  %s2215_s4 = smov (%p38_p6, %s2213_s4), 0 }
  0x3b   : > { %2193 = sst [smem:[#allocation17_spill]] %s2215_s4  ;;  %s172_s7 = sand.u32 1, %s1739_s14  }
  0x3c   : > { %s1076_s8 = sshll.u32 %s1751_s17, 5  ;;  %s40_s9 = ssub.s32 %s1755_s18, %s2215_s4 }
  0x3d   : > { %s42_s10 = sor.u32 %s41_s29, %s40_s9  ;;  %s1075_s21 = sshll.u32 %s172_s7, 8 }
  0x3e   : > { %p43_p13 = scmp.eq.s32.totalorder %s42_s10, 0  ;;  %s1077_s23 = sshll.u32 %s1755_s18, 6 }
  0x3f   : > { %s176_s27 = scalar_lea.vmem [#allocation2], %s1075_s21  ;;  %s182_s1 = sadd.s32 %s1077_s23, %s1076_s8 }
  0x40   : > { %s185_s11 = sshll.u32 %s176_s27, 4  ;;  %s1078_s30 = sshll.u32 %s182_s1, 7  ;;  %s1917_s11 = int_to_ptr.vmem [resolvable:$true] %s185_s11 }
  0x41   : > { %s1915_s20 = scalar_select %p43_p13, %s1739_s14, %s45_s5  }
  0x42   : > { %p1923_p0 = pnand %p1470_p12, %p1902_p10  ;;  %s1930_s29 = scalar_lea.hbm %s2165_s0, %s1078_s30 }
  0x43   : > { %s1932_s5 = scalar_lea.sflag [#allocation3], %s172_s7  ;;  %s1595_s1 = scalar_lea.hbm %s1930_s29, 4096 }
  0x44   : > { %p1596_p3 = scmp.ne.s32.totalorder %s1930_s29, %s1595_s1  ;;  %p1597_p5 = pneg %p1923_p0 }
  0x45   : > { %s1600_s4 = scalar_lea.hbm %s2165_s0, 16384  ;;  %p1601_p1 = scmp.lt.u32.totalorder %s1930_s29, %s2165_s0 }
  0x46   : > { %p1598_p7 = pnand %p1597_p5, %p1596_p3  ;;  %p1602_p2 = scmp.lt.u32.totalorder %s1600_s4, %s1595_s1 }
  0x47   : > { %p1604_p6 = scmp.lt.u32.totalorder %s1595_s1, %s1930_s29 }
  0x48   : > { %p1599_p9 = pneg %p1598_p7  ;;  %p1603_p4 = por %p1602_p2, %p1601_p1 }
  0x4a   : > { %p1605_p8 = por %p1604_p6, %p1603_p4 }
  0x4c   : > { %p1606_p10 = pnand %p1605_p8, %p1599_p9 }
  0x4e   : > { %1609 = shalt.err (!%p1606_p10)
}
  0x4f   : > { %s1610_s7 = scalar_lea.vmem %s1917_s11, 4096  ;;  %s1764_s9 = smov [#allocation2]  }
  0x50   : > { %p1611_p12 = scmp.ne.s32.totalorder %s1917_s11, %s1610_s7  ;;  %s1615_s10 = sshll.u32 %s1764_s9, 4  ;;  %s1616_s10 = int_to_ptr.vmem [resolvable:$false] %s1615_s10 }
  0x51   : > { %s1617_s21 = scalar_lea.vmem %s1616_s10, 8192  ;;  %p1618_p7 = scmp.lt.s32.totalorder %s1917_s11, %s1616_s10 }
  0x52   : > { %p1613_p13 = pnand %p1611_p12, %p1597_p5  ;;  %p1619_p1 = scmp.lt.s32.totalorder %s1617_s21, %s1610_s7 }
  0x54   : > { %p1614_p3 = pneg %p1613_p13  ;;  %p1620_p2 = por %p1619_p1, %p1618_p7 }
  0x56   : > { %p1621_p4 = pnand %p1620_p2, %p1614_p3 }
  0x58   : > { %1624 = shalt.err (!%p1621_p4)
}
  0x59   : > { %s2195_s23 = smov 8   ;;  %s2196_s27 = smov 128  }
  0x5a   : > { %1461 = dma.hbm_to_vmem [thread:$0]  (!%p1923_p0), %s1930_s29, 4096, %s1917_s11, %s1932_s5, %s2196_s27, %s2196_s27, %s2195_s23  }
  0x5b   : > { %p2197_p5 = scmp.ne.s32.totalorder %s2186_s26, 0 }
  0x5c   : > { %s1966_s1 = sand.u32 (!%p2197_p5), 1, %s1735_s13   ;;  %p2198_p9 = scmp.ne.s32.totalorder (!%p2197_p5), %s2183_s24, 0 }
  0x5d   : > { %197 = sbr.rel (%p2197_p5) target bundleno = 449 (0x1c1), region = 28  ;;  %s1080_s28 = sshll.u32 (!%p2197_p5), %s1966_s1, 8 }
  0x5e   : > { %s200_s17 = scalar_lea.sflag (!%p2197_p5), [#allocation3], %s1966_s1  ;;  %s1970_s4 = scalar_lea.vmem (!%p2197_p5), [#allocation2], %s1080_s28 }
  0x64   : > { %1714 = dma.done.wait (%p2198_p9), %s200_s17, 4096  }
  0x65   : > { %1716 = vsyncadd (%p2198_p9), %s200_s17, 4294963200  ;;  %p2199_p0 = scmp.ne.s32.totalorder %s2181_s22, 0 }
  0x67   : > { %1718 = dma.done.wait (%p2199_p0), [#allocation6], 2048  }
  0x68   : > { %1720 = vsyncadd (%p2199_p0), [#allocation6], 4294965248  ;;  %v1765_v0 = vmov 0   ;;  %v1543_v1 = vld [vmem:[#allocation5 + $0x4] ss:$8 sps:$4 sm:$0xff]   ;;  %v241_v23 = vld [vmem:[%s1970_s4 + $0x10] sm:$0xff] }
  0x69   : > { %415 = vmatprep.mubr.bf16.mxu0 %v1765_v0  ;;  %495 = vmatprep.mubr.bf16.mxu1 %v1765_v0  ;;  %v1545_v2 = vld [vmem:[#allocation5] ss:$8 sps:$4 sm:$0xff]   ;;  %v1546_v3 = vld [vmem:[#allocation5 + $0x14] ss:$8 sps:$4 sm:$0xff]   ;;  %v1548_v4 = vld [vmem:[#allocation5 + $0x10] ss:$8 sps:$4 sm:$0xff]  }
  0x6a   : > { %383 = vmatprep.subr.bf16.mxu0 %v1543_v1  ;;  %1428 = vmatprep.subr.bf16.mxu1 %v1543_v1  ;;  %v1549_v5 = vld [vmem:[#allocation5 + $0x24] ss:$8 sps:$4 sm:$0xff]   ;;  %v1551_v6 = vld [vmem:[#allocation5 + $0x20] ss:$8 sps:$4 sm:$0xff]   ;;  %v1552_v7 = vld [vmem:[#allocation5 + $0x34] ss:$8 sps:$4 sm:$0xff]  }
  0x6b   : > { %384 = vmatpush1.bf16.msra.mxu0 %v1545_v2  ;;  %1436 = vmatpush1.bf16.msra.mxu1 %v1545_v2  ;;  %v1554_v8 = vld [vmem:[#allocation5 + $0x30] ss:$8 sps:$4 sm:$0xff]   ;;  %v1555_v9 = vld [vmem:[#allocation5 + $0x44] ss:$8 sps:$4 sm:$0xff]   ;;  %v1557_v10 = vld [vmem:[#allocation5 + $0x40] ss:$8 sps:$4 sm:$0xff]  }
  0x6c   : > { %385 = vmatprep.subr.bf16.mxu0 %v1546_v3  ;;  %1429 = vmatprep.subr.bf16.mxu1 %v1546_v3  ;;  %v1558_v11 = vld [vmem:[#allocation5 + $0x54] ss:$8 sps:$4 sm:$0xff]   ;;  %v1560_v12 = vld [vmem:[#allocation5 + $0x50] ss:$8 sps:$4 sm:$0xff]   ;;  %v1561_v13 = vld [vmem:[#allocation5 + $0x64] ss:$8 sps:$4 sm:$0xff]  }
  0x6d   : > { %v1563_v14 = vld [vmem:[#allocation5 + $0x60] ss:$8 sps:$4 sm:$0xff]   ;;  %v1564_v15 = vld [vmem:[#allocation5 + $0x74] ss:$8 sps:$4 sm:$0xff]   ;;  %v1566_v16 = vld [vmem:[#allocation5 + $0x70] ss:$8 sps:$4 sm:$0xff]  }
  0x6e   : > { %v239_v17 = vld [vmem:[%s1970_s4] sm:$0xff]  ;;  %v240_v18 = vld [vmem:[%s1970_s4 + $0x8] sm:$0xff]  ;;  %v242_v24 = vld [vmem:[%s1970_s4 + $0x18] sm:$0xff]  ;;  %s1082_s22 = sshll.u32 %s1966_s1, 7  ;;  %s1166_s26 = sshll.u32 %s1743_s15, 5 }
  0x6f   : > { %386 = vmatpush1.bf16.msra.mxu0 %v1548_v4  ;;  %1437 = vmatpush1.bf16.msra.mxu1 %v1548_v4  ;;  %v255_v19 = vld [vmem:[%s1970_s4 + $0x80] sm:$0xff]  ;;  %v256_v20 = vld [vmem:[%s1970_s4 + $0x88] sm:$0xff]  ;;  %v271_v21 = vpack.c.bf16 %v240_v18, %v239_v17  ;;  %v257_v25 = vld [vmem:[%s1970_s4 + $0x90] sm:$0xff]  ;;  %v272_v27 = vpack.c.bf16 %v242_v24, %v241_v23  ;;  %s2029_s24 = scalar_lea.vmem [#allocation7], %s1082_s22  ;;  %s2033_s25 = scalar_lea.vmem [#allocation8], %s1082_s22 }
  0x70   : > { %387 = vmatprep.subr.bf16.mxu0 %v1549_v5  ;;  %1430 = vmatprep.subr.bf16.mxu1 %v1549_v5  ;;  %v279_v22 = vpack.c.bf16 %v256_v20, %v255_v19  ;;  %v258_v26 = vld [vmem:[%s1970_s4 + $0x98] sm:$0xff]  ;;  %v243_v29 = vld [vmem:[%s1970_s4 + $0x20] sm:$0xff]  ;;  %v244_v30 = vld [vmem:[%s1970_s4 + $0x28] sm:$0xff]  ;;  %s1167_s11 = sshll.u32 %s1747_s16, 6  ;;  %s917_s5 = sshll.u32 %s2029_s24, 4  ;;  %s2070_s5 = int_to_ptr.vmem [resolvable:$true] %s917_s5 }
  0x71   : > { %v280_v28 = vpack.c.bf16 %v258_v26, %v257_v25  ;;  %v259_v31 = vld [vmem:[%s1970_s4 + $0xa0] sm:$0xff]  ;;  %v260_v32 = vld [vmem:[%s1970_s4 + $0xa8] sm:$0xff]  ;;  %v273_v33 = vpack.c.bf16 %v244_v30, %v243_v29  ;;  %v245_v35 = vld [vmem:[%s1970_s4 + $0x30] sm:$0xff]  ;;  %s914_s29 = sadd.s32 %s1167_s11, %s1166_s26  ;;  %s935_s7 = sshll.u32 %s2033_s25, 4  ;;  %s2077_s7 = int_to_ptr.vmem [resolvable:$true] %s935_s7 }
  0x72   : > { %v281_v34 = vpack.c.bf16 %v260_v32, %v259_v31  ;;  %v246_v36 = vld [vmem:[%s1970_s4 + $0x38] sm:$0xff]  ;;  %v261_v37 = vld [vmem:[%s1970_s4 + $0xb0] sm:$0xff]  ;;  %v247_v41 = vld [vmem:[%s1970_s4 + $0x40] sm:$0xff]  ;;  %s1168_s15 = sshll.u32 %s914_s29, 6  ;;  %s897_s23 = scalar_lea.sflag [#allocation4], %s1966_s1 }
  0x73   : > { %388 = vmatpush1.bf16.msra.mxu0 %v1551_v6  ;;  %1438 = vmatpush1.bf16.msra.mxu1 %v1551_v6  ;;  %v262_v38 = vld [vmem:[%s1970_s4 + $0xb8] sm:$0xff]  ;;  %v274_v39 = vpack.c.bf16 %v246_v36, %v245_v35  ;;  %v248_v42 = vld [vmem:[%s1970_s4 + $0x48] sm:$0xff]  ;;  %v263_v43 = vld [vmem:[%s1970_s4 + $0xc0] sm:$0xff]  ;;  %s2067_s8 = scalar_lea.hbm %s2167_s2, %s1168_s15  ;;  %s2075_s21 = scalar_lea.hbm %s2168_s3, %s1168_s15 }
  0x74   : > { %389 = vmatprep.subr.bf16.mxu0 %v1552_v7  ;;  %1431 = vmatprep.subr.bf16.mxu1 %v1552_v7  ;;  %v282_v40 = vpack.c.bf16 %v262_v38, %v261_v37  ;;  %v264_v44 = vld [vmem:[%s1970_s4 + $0xc8] sm:$0xff]  ;;  %v275_v45 = vpack.c.bf16 %v248_v42, %v247_v41  ;;  %v249_v47 = vld [vmem:[%s1970_s4 + $0x50] sm:$0xff]  ;;  %v250_v48 = vld [vmem:[%s1970_s4 + $0x58] sm:$0xff]  ;;  %s1625_s27 = scalar_lea.vmem %s2070_s5, 2048  ;;  %s1766_s28 = smov [#allocation7]  }
  0x75   : > { %v283_v46 = vpack.c.bf16 %v264_v44, %v263_v43  ;;  %v265_v49 = vld [vmem:[%s1970_s4 + $0xd0] sm:$0xff]  ;;  %v266_v50 = vld [vmem:[%s1970_s4 + $0xd8] sm:$0xff]  ;;  %v276_v51 = vpack.c.bf16 %v250_v48, %v249_v47  ;;  %v251_v53 = vld [vmem:[%s1970_s4 + $0x60] sm:$0xff]  ;;  %p1626_p6 = scmp.ne.s32.totalorder %s2070_s5, %s1625_s27  ;;  %s1629_s17 = sshll.u32 %s1766_s28, 4  ;;  %s1630_s17 = int_to_ptr.vmem [resolvable:$false] %s1629_s17 }
  0x76   : > { %v284_v52 = vpack.c.bf16 %v266_v50, %v265_v49  ;;  %v252_v54 = vld [vmem:[%s1970_s4 + $0x68] sm:$0xff]  ;;  %v267_v55 = vld [vmem:[%s1970_s4 + $0xe0] sm:$0xff]  ;;  %v253_v59 = vld [vmem:[%s1970_s4 + $0x70] sm:$0xff]  ;;  %p1632_p12 = scmp.lt.s32.totalorder %s2070_s5, %s1630_s17 }
  0x77   : > { %390 = vmatpush1.bf16.msra.mxu0 %v1554_v8  ;;  %1439 = vmatpush1.bf16.msra.mxu1 %v1554_v8  ;;  %v268_v56 = vld [vmem:[%s1970_s4 + $0xe8] sm:$0xff]  ;;  %v277_v57 = vpack.c.bf16 %v252_v54, %v251_v53  ;;  %v254_v60 = vld [vmem:[%s1970_s4 + $0x78] sm:$0xff]  ;;  %v269_v61 = vld [vmem:[%s1970_s4 + $0xf0] sm:$0xff]  ;;  %p1627_p8 = pnand %p1626_p6, %p1898_p11 }
  0x78   : > { %391 = vmatprep.subr.bf16.mxu0 %v1555_v9  ;;  %1432 = vmatprep.subr.bf16.mxu1 %v1555_v9  ;;  %v285_v58 = vpack.c.bf16 %v268_v56, %v267_v55  ;;  %v270_v62 = vld [vmem:[%s1970_s4 + $0xf8] sm:$0xff]  ;;  %v278_v63 = vpack.c.bf16 %v254_v60, %v253_v59  ;;  %s1631_s4 = scalar_lea.vmem %s1630_s17, 4096 }
  0x79   : > { %v286_v1 = vpack.c.bf16 %v270_v62, %v269_v61  ;;  %p1628_p10 = pneg %p1627_p8  ;;  %p1633_p13 = scmp.lt.s32.totalorder %s1631_s4, %s1625_s27 }
  0x7b   : > { %392 = vmatpush1.bf16.msra.mxu0 %v1557_v10  ;;  %1440 = vmatpush1.bf16.msra.mxu1 %v1557_v10  ;;  %p1634_p3 = por %p1633_p13, %p1632_p12 }
  0x7c   : > { %393 = vmatprep.subr.bf16.mxu0 %v1558_v11  ;;  %1433 = vmatprep.subr.bf16.mxu1 %v1558_v11 }
  0x7d   : > { %p1635_p7 = pnand %p1634_p3, %p1628_p10 }
  0x7f   : > { %394 = vmatpush1.bf16.msra.mxu0 %v1560_v12  ;;  %1441 = vmatpush1.bf16.msra.mxu1 %v1560_v12 }
  0x80   : > { %395 = vmatprep.subr.bf16.mxu0 %v1561_v13  ;;  %1434 = vmatprep.subr.bf16.mxu1 %v1561_v13 }
  0x83   : > { %396 = vmatpush1.bf16.msra.mxu0 %v1563_v14  ;;  %1442 = vmatpush1.bf16.msra.mxu1 %v1563_v14 }
  0x84   : > { %397 = vmatprep.subr.bf16.mxu0 %v1564_v15  ;;  %1435 = vmatprep.subr.bf16.mxu1 %v1564_v15 }
  0x87   : > { %398 = vmatpush1.bf16.msra.mxu0 %v1566_v16  ;;  %1443 = vmatpush1.bf16.msra.mxu1 %v1566_v16 }
  0x8a   : > { %416 = vmatmul.mubr.bf16.vlgmr.msra.gmra.mrb[0].mxu0 %v271_v21  ;;  %496 = vmatmul.mubr.bf16.vlgmr.msra.gmra.mrb[0].mxu1 %v279_v22 }
  0x8b   : > { %425 = vmatprep.mubr.bf16.mxu0 %v1765_v0  ;;  %505 = vmatprep.mubr.bf16.mxu1 %v1765_v0 }
  0x92   : > { %426 = vmatmul.mubr.bf16.gmra.mrb[4].mxu0 %v272_v27  ;;  %506 = vmatmul.mubr.bf16.gmra.mrb[4].mxu1 %v280_v28 }
  0x93   : > { %435 = vmatprep.mubr.bf16.mxu0 %v1765_v0  ;;  %515 = vmatprep.mubr.bf16.mxu1 %v1765_v0 }
  0x9a   : > { %436 = vmatmul.mubr.bf16.gmra.mrb[8].mxu0 %v273_v33  ;;  %516 = vmatmul.mubr.bf16.gmra.mrb[8].mxu1 %v281_v34 }
  0x9b   : > { %445 = vmatprep.mubr.bf16.mxu0 %v1765_v0  ;;  %525 = vmatprep.mubr.bf16.mxu1 %v1765_v0 }
  0xa2   : > { %446 = vmatmul.mubr.bf16.gmra.mrb[12].mxu0 %v274_v39  ;;  %526 = vmatmul.mubr.bf16.gmra.mrb[12].mxu1 %v282_v40 }
  0xa3   : > { %455 = vmatprep.mubr.bf16.mxu0 %v1765_v0  ;;  %535 = vmatprep.mubr.bf16.mxu1 %v1765_v0 }
  0xaa   : > { %456 = vmatmul.mubr.bf16.gmra.mrb[16].mxu0 %v275_v45  ;;  %536 = vmatmul.mubr.bf16.gmra.mrb[16].mxu1 %v283_v46 }
  0xab   : > { %465 = vmatprep.mubr.bf16.mxu0 %v1765_v0  ;;  %545 = vmatprep.mubr.bf16.mxu1 %v1765_v0 }
  0xb2   : > { %466 = vmatmul.mubr.bf16.gmra.mrb[20].mxu0 %v276_v51  ;;  %546 = vmatmul.mubr.bf16.gmra.mrb[20].mxu1 %v284_v52 }
  0xb3   : > { %475 = vmatprep.mubr.bf16.mxu0 %v1765_v0  ;;  %555 = vmatprep.mubr.bf16.mxu1 %v1765_v0 }
  0xba   : > { %476 = vmatmul.mubr.bf16.gmra.mrb[24].mxu0 %v277_v57  ;;  %556 = vmatmul.mubr.bf16.gmra.mrb[24].mxu1 %v285_v58 }
  0xbb   : > { %485 = vmatprep.mubr.bf16.mxu0 %v1765_v0  ;;  %565 = vmatprep.mubr.bf16.mxu1 %v1765_v0 }
  0xc2   : > { %486 = vmatmul.mubr.bf16.gmra.mrb[28].mxu0 %v278_v63  ;;  %566 = vmatmul.mubr.bf16.gmra.mrb[28].mxu1 %v286_v1 }
 0x15d   : > { %v417_v2 = vpop.f32.mrb[0].mxu0  ;;  %v497_v3 = vpop.f32.mrb[0].mxu1 }
 0x15e   : > { %v419_v4 = vpop.f32.mrb[1].mxu0  ;;  %v499_v5 = vpop.f32.mrb[1].mxu1 }
 0x15f   : > { %v421_v6 = vpop.f32.mrb[2].mxu0  ;;  %v501_v7 = vpop.f32.mrb[2].mxu1 }
 0x160   : > { %v1241_v8 = vpack.c.bf16 %v421_v6, %v417_v2  ;;  %v1281_v9 = vpack.c.bf16 %v501_v7, %v497_v3  ;;  %v423_v10 = vpop.f32.mrb[3].mxu0  ;;  %v503_v11 = vpop.f32.mrb[3].mxu1 }
 0x161   : > { %v1321_v12 = vpack.c.bf16 %v423_v10, %v419_v4  ;;  %v1361_v0 = vpack.c.bf16 %v503_v11, %v499_v5 }
 0x162   : > { %1242 = vst [vmem:[%s2029_s24] sm:$0xff] %v1241_v8   ;;  %1405 = vst [vmem:[%s2029_s24 + $0x40] sm:$0xff] %v1281_v9  }
 0x163   : > { %1322 = vst [vmem:[%s2033_s25] sm:$0xff] %v1321_v12   ;;  %1420 = vst [vmem:[%s2033_s25 + $0x40] sm:$0xff] %v1361_v0  }
 0x165   : > { %v427_v13 = vpop.f32.mrb[4].mxu0  ;;  %v507_v14 = vpop.f32.mrb[4].mxu1 }
 0x166   : > { %v429_v15 = vpop.f32.mrb[5].mxu0  ;;  %v509_v16 = vpop.f32.mrb[5].mxu1 }
 0x167   : > { %v431_v17 = vpop.f32.mrb[6].mxu0  ;;  %v511_v18 = vpop.f32.mrb[6].mxu1 }
 0x168   : > { %v1246_v19 = vpack.c.bf16 %v431_v17, %v427_v13  ;;  %v1286_v20 = vpack.c.bf16 %v511_v18, %v507_v14  ;;  %v433_v21 = vpop.f32.mrb[7].mxu0  ;;  %v513_v22 = vpop.f32.mrb[7].mxu1 }
 0x169   : > { %v1326_v23 = vpack.c.bf16 %v433_v21, %v429_v15  ;;  %v1366_v24 = vpack.c.bf16 %v513_v22, %v509_v16 }
 0x16a   : > { %1398 = vst [vmem:[%s2029_s24 + $0x8] sm:$0xff] %v1246_v19   ;;  %1406 = vst [vmem:[%s2029_s24 + $0x48] sm:$0xff] %v1286_v20  }
 0x16b   : > { %1413 = vst [vmem:[%s2033_s25 + $0x8] sm:$0xff] %v1326_v23   ;;  %1421 = vst [vmem:[%s2033_s25 + $0x48] sm:$0xff] %v1366_v24  }
 0x16d   : > { %v437_v25 = vpop.f32.mrb[8].mxu0  ;;  %v517_v26 = vpop.f32.mrb[8].mxu1 }
 0x16e   : > { %v439_v27 = vpop.f32.mrb[9].mxu0  ;;  %v519_v28 = vpop.f32.mrb[9].mxu1 }
 0x16f   : > { %v441_v29 = vpop.f32.mrb[10].mxu0  ;;  %v521_v30 = vpop.f32.mrb[10].mxu1 }
 0x170   : > { %v1251_v31 = vpack.c.bf16 %v441_v29, %v437_v25  ;;  %v1291_v32 = vpack.c.bf16 %v521_v30, %v517_v26  ;;  %v443_v33 = vpop.f32.mrb[11].mxu0  ;;  %v523_v34 = vpop.f32.mrb[11].mxu1 }
 0x171   : > { %v1331_v35 = vpack.c.bf16 %v443_v33, %v439_v27  ;;  %v1371_v36 = vpack.c.bf16 %v523_v34, %v519_v28 }
 0x172   : > { %1399 = vst [vmem:[%s2029_s24 + $0x10] sm:$0xff] %v1251_v31   ;;  %1407 = vst [vmem:[%s2029_s24 + $0x50] sm:$0xff] %v1291_v32  }
 0x173   : > { %1414 = vst [vmem:[%s2033_s25 + $0x10] sm:$0xff] %v1331_v35   ;;  %1422 = vst [vmem:[%s2033_s25 + $0x50] sm:$0xff] %v1371_v36  }
 0x175   : > { %v447_v37 = vpop.f32.mrb[12].mxu0  ;;  %v527_v38 = vpop.f32.mrb[12].mxu1 }
 0x176   : > { %v449_v39 = vpop.f32.mrb[13].mxu0  ;;  %v529_v40 = vpop.f32.mrb[13].mxu1 }
 0x177   : > { %v451_v41 = vpop.f32.mrb[14].mxu0  ;;  %v531_v42 = vpop.f32.mrb[14].mxu1 }
 0x178   : > { %v1256_v43 = vpack.c.bf16 %v451_v41, %v447_v37  ;;  %v1296_v44 = vpack.c.bf16 %v531_v42, %v527_v38  ;;  %v453_v45 = vpop.f32.mrb[15].mxu0  ;;  %v533_v46 = vpop.f32.mrb[15].mxu1 }
 0x179   : > { %v1336_v47 = vpack.c.bf16 %v453_v45, %v449_v39  ;;  %v1376_v48 = vpack.c.bf16 %v533_v46, %v529_v40 }
 0x17a   : > { %1400 = vst [vmem:[%s2029_s24 + $0x18] sm:$0xff] %v1256_v43   ;;  %1408 = vst [vmem:[%s2029_s24 + $0x58] sm:$0xff] %v1296_v44  }
 0x17b   : > { %1415 = vst [vmem:[%s2033_s25 + $0x18] sm:$0xff] %v1336_v47   ;;  %1423 = vst [vmem:[%s2033_s25 + $0x58] sm:$0xff] %v1376_v48  }
 0x17d   : > { %v457_v49 = vpop.f32.mrb[16].mxu0  ;;  %v537_v50 = vpop.f32.mrb[16].mxu1 }
 0x17e   : > { %v459_v51 = vpop.f32.mrb[17].mxu0  ;;  %v539_v52 = vpop.f32.mrb[17].mxu1 }
 0x17f   : > { %v461_v53 = vpop.f32.mrb[18].mxu0  ;;  %v541_v54 = vpop.f32.mrb[18].mxu1 }
 0x180   : > { %v1261_v55 = vpack.c.bf16 %v461_v53, %v457_v49  ;;  %v1301_v56 = vpack.c.bf16 %v541_v54, %v537_v50  ;;  %v463_v57 = vpop.f32.mrb[19].mxu0  ;;  %v543_v58 = vpop.f32.mrb[19].mxu1 }
 0x181   : > { %v1341_v59 = vpack.c.bf16 %v463_v57, %v459_v51  ;;  %v1381_v60 = vpack.c.bf16 %v543_v58, %v539_v52 }
 0x182   : > { %1401 = vst [vmem:[%s2029_s24 + $0x20] sm:$0xff] %v1261_v55   ;;  %1409 = vst [vmem:[%s2029_s24 + $0x60] sm:$0xff] %v1301_v56  }
 0x183   : > { %1416 = vst [vmem:[%s2033_s25 + $0x20] sm:$0xff] %v1341_v59   ;;  %1424 = vst [vmem:[%s2033_s25 + $0x60] sm:$0xff] %v1381_v60  }
 0x185   : > { %v467_v61 = vpop.f32.mrb[20].mxu0  ;;  %v547_v62 = vpop.f32.mrb[20].mxu1 }
 0x186   : > { %v469_v63 = vpop.f32.mrb[21].mxu0  ;;  %v549_v1 = vpop.f32.mrb[21].mxu1 }
 0x187   : > { %v471_v2 = vpop.f32.mrb[22].mxu0  ;;  %v551_v3 = vpop.f32.mrb[22].mxu1 }
 0x188   : > { %v1266_v4 = vpack.c.bf16 %v471_v2, %v467_v61  ;;  %v1306_v5 = vpack.c.bf16 %v551_v3, %v547_v62  ;;  %v473_v6 = vpop.f32.mrb[23].mxu0  ;;  %v553_v7 = vpop.f32.mrb[23].mxu1 }
 0x189   : > { %v1346_v8 = vpack.c.bf16 %v473_v6, %v469_v63  ;;  %v1386_v9 = vpack.c.bf16 %v553_v7, %v549_v1 }
 0x18a   : > { %1402 = vst [vmem:[%s2029_s24 + $0x28] sm:$0xff] %v1266_v4   ;;  %1410 = vst [vmem:[%s2029_s24 + $0x68] sm:$0xff] %v1306_v5  }
 0x18b   : > { %1417 = vst [vmem:[%s2033_s25 + $0x28] sm:$0xff] %v1346_v8   ;;  %1425 = vst [vmem:[%s2033_s25 + $0x68] sm:$0xff] %v1386_v9  }
 0x18d   : > { %v477_v10 = vpop.f32.mrb[24].mxu0  ;;  %v557_v11 = vpop.f32.mrb[24].mxu1 }
 0x18e   : > { %v479_v12 = vpop.f32.mrb[25].mxu0  ;;  %v559_v0 = vpop.f32.mrb[25].mxu1 }
 0x18f   : > { %v481_v13 = vpop.f32.mrb[26].mxu0  ;;  %v561_v14 = vpop.f32.mrb[26].mxu1 }
 0x190   : > { %v1271_v15 = vpack.c.bf16 %v481_v13, %v477_v10  ;;  %v1311_v16 = vpack.c.bf16 %v561_v14, %v557_v11  ;;  %v483_v17 = vpop.f32.mrb[27].mxu0  ;;  %v563_v18 = vpop.f32.mrb[27].mxu1 }
 0x191   : > { %v1351_v19 = vpack.c.bf16 %v483_v17, %v479_v12  ;;  %v1391_v20 = vpack.c.bf16 %v563_v18, %v559_v0 }
 0x192   : > { %1403 = vst [vmem:[%s2029_s24 + $0x30] sm:$0xff] %v1271_v15   ;;  %1411 = vst [vmem:[%s2029_s24 + $0x70] sm:$0xff] %v1311_v16  }
 0x193   : > { %1418 = vst [vmem:[%s2033_s25 + $0x30] sm:$0xff] %v1351_v19   ;;  %1426 = vst [vmem:[%s2033_s25 + $0x70] sm:$0xff] %v1391_v20  }
 0x195   : > { %v487_v21 = vpop.f32.mrb[28].mxu0  ;;  %v567_v22 = vpop.f32.mrb[28].mxu1 }
 0x196   : > { %v489_v23 = vpop.f32.mrb[29].mxu0  ;;  %v569_v24 = vpop.f32.mrb[29].mxu1 }
 0x197   : > { %v491_v25 = vpop.f32.mrb[30].mxu0  ;;  %v571_v26 = vpop.f32.mrb[30].mxu1 }
 0x198   : > { %v1276_v27 = vpack.c.bf16 %v491_v25, %v487_v21  ;;  %v1316_v28 = vpack.c.bf16 %v571_v26, %v567_v22  ;;  %v493_v29 = vpop.f32.mrb[31].mxu0  ;;  %v573_v30 = vpop.f32.mrb[31].mxu1 }
 0x199   : > { %v1356_v31 = vpack.c.bf16 %v493_v29, %v489_v23  ;;  %v1396_v32 = vpack.c.bf16 %v573_v30, %v569_v24 }
 0x19a   : > { %1404 = vst [vmem:[%s2029_s24 + $0x38] sm:$0xff] %v1276_v27   ;;  %1412 = vst [vmem:[%s2029_s24 + $0x78] sm:$0xff] %v1316_v28  }
 0x19b   : > { %1419 = vst [vmem:[%s2033_s25 + $0x38] sm:$0xff] %v1356_v31   ;;  %1427 = vst [vmem:[%s2033_s25 + $0x78] sm:$0xff] %v1396_v32  }
 0x19c   : > { %1638 = shalt.err (!%p1635_p7)
}
 0x19d   : > { %s1639_s22 = scalar_lea.hbm %s2067_s8, 2048  ;;  %s1643_s26 = scalar_lea.hbm %s2167_s2, 8192 }
 0x19e   : > { %p1640_p1 = scmp.ne.s32.totalorder %s2067_s8, %s1639_s22  ;;  %p1644_p5 = scmp.lt.u32.totalorder %s2067_s8, %s2167_s2 }
 0x19f   : > { %p1645_p9 = scmp.lt.u32.totalorder %s1643_s26, %s1639_s22  ;;  %p1647_p6 = scmp.lt.u32.totalorder %s1639_s22, %s2067_s8 }
 0x1a0   : > { %p1641_p2 = pnand %p1640_p1, %p1898_p11 }
 0x1a1   : > { %p1646_p0 = por %p1645_p9, %p1644_p5 }
 0x1a2   : > { %p1642_p4 = pneg %p1641_p2 }
 0x1a3   : > { %p1648_p8 = por %p1647_p6, %p1646_p0 }
 0x1a5   : > { %p1649_p10 = pnand %p1648_p8, %p1642_p4 }
 0x1a7   : > { %1652 = shalt.err (!%p1649_p10)
}
 0x1a8   : > { %s1767_s15 = smov 64   ;;  %s1768_s16 = smov 4  }
 0x1a9   : > { %1450 = dma.vmem_to_hbm [thread:$0]  (%p1898_p11), %s2070_s5, 2048, %s2067_s8, %s897_s23, %s1767_s15, %s1767_s15, %s1768_s16  }
 0x1aa   : > { %s902_s30 = scalar_lea.sflag [#allocation9], %s1966_s1  ;;  %s1653_s9 = scalar_lea.vmem %s2077_s7, 2048 }
 0x1ab   : > { %p1654_p12 = scmp.ne.s32.totalorder %s2077_s7, %s1653_s9  ;;  %s1769_s10 = smov [#allocation8]  }
 0x1ac   : > { %s1657_s27 = sshll.u32 %s1769_s10, 4  ;;  %s1658_s27 = int_to_ptr.vmem [resolvable:$false] %s1657_s27 }
 0x1ad   : > { %p1655_p13 = pnand %p1654_p12, %p1898_p11  ;;  %s1659_s28 = scalar_lea.vmem %s1658_s27, 4096 }
 0x1ae   : > { %p1660_p7 = scmp.lt.s32.totalorder %s2077_s7, %s1658_s27  ;;  %p1661_p1 = scmp.lt.s32.totalorder %s1659_s28, %s1653_s9 }
 0x1af   : > { %p1656_p3 = pneg %p1655_p13 }
 0x1b0   : > { %p1662_p2 = por %p1661_p1, %p1660_p7 }
 0x1b2   : > { %p1663_p4 = pnand %p1662_p2, %p1656_p3 }
 0x1b4   : > { %1666 = shalt.err (!%p1663_p4)
}
 0x1b5   : > { %s1667_s5 = scalar_lea.hbm %s2075_s21, 2048  ;;  %s1671_s17 = scalar_lea.hbm %s2168_s3, 8192 }
 0x1b6   : > { %p1668_p5 = scmp.ne.s32.totalorder %s2075_s21, %s1667_s5  ;;  %p1672_p6 = scmp.lt.u32.totalorder %s2075_s21, %s2168_s3 }
 0x1b7   : > { %p1673_p8 = scmp.lt.u32.totalorder %s1671_s17, %s1667_s5  ;;  %p1675_p12 = scmp.lt.u32.totalorder %s1667_s5, %s2075_s21 }
 0x1b8   : > { %p1669_p9 = pnand %p1668_p5, %p1898_p11 }
 0x1b9   : > { %p1674_p10 = por %p1673_p8, %p1672_p6 }
 0x1ba   : > { %p1670_p0 = pneg %p1669_p9 }
 0x1bb   : > { %p1676_p13 = por %p1675_p12, %p1674_p10 }
 0x1bd   : > { %p1677_p3 = pnand %p1676_p13, %p1670_p0 }
 0x1bf   : > { %1680 = shalt.err (!%p1677_p3)
}
 0x1c0   : > { %1451 = dma.vmem_to_hbm [thread:$0]  (%p1898_p11), %s2077_s7, 2048, %s2075_s21, %s902_s30, %s1767_s15, %s1767_s15, %s1768_s16  }
 0x1c1 PF: > { %s2200_s24 = sld [smem:[#allocation15_spill]]  ;;  %p1472_p7 = scmp.ge.s32.totalorder %s1759_s19, 2 }
 0x1c2   : > { %s950_s25 = sand.u32 1, %s1731_s12  }
 0x1c3   : > { %s951_s26 = scalar_lea.sflag [#allocation4], %s950_s25 }
 0x1c7   : > { %p2201_p1 = scmp.ne.s32.totalorder %s2200_s24, 0 }
 0x1c9   : > { %p1463_p2 = pnand %p1472_p7, %p2201_p1 }
 0x1cb   : > { %1722 = dma.done.wait (!%p1463_p2), %s951_s26, 2048  }
 0x1cc   : > { %1724 = vsyncadd (!%p1463_p2), %s951_s26, 4294965248  ;;  %s960_s6 = scalar_lea.sflag [#allocation9], %s950_s25 }
 0x1cd   : > { %1726 = dma.done.wait (!%p1463_p2), %s960_s6, 2048  }
 0x1ce   : > { %1728 = vsyncadd (!%p1463_p2), %s960_s6, 4294965248  ;;  %s24_s19 = sadd.s32 1, %s1759_s19   ;;  %s2202_s15 = sld [smem:[#allocation14_spill]] }
 0x1cf   : > { %p21_p4 = scmp.ge.s32.totalorder %s24_s19, 6   ;;  %s2203_s17 = sld [smem:[#allocation16_spill]] }
 0x1d0   : > { %s2204_s1 = sld [smem:[#allocation17_spill]]  ;;  %s2205_s12 = smov %s1735_s13 }
 0x1d1   : > { %s2206_s13 = smov %s1739_s14  ;;  %s2207_s14 = smov %s1915_s20 }
 0x1d2   : > { %s2208_s16 = smov %s1755_s18  ;;  %23 = sbr.rel (!%p21_p4) target bundleno = 12 (0xc), region = 94 }
 0x1d6   : > { %s2209_s18 = smov %s2204_s1 }
 0x1d9   :  { %965 = vsyncpa [#allocation3], 1 }
 0x1da   :  { %967 = vsyncpa [#allocation3 + $0x1], 1 }
 0x1db   :  { %968 = vsyncpa [#allocation6], 1 }
 0x1dc   :  { %969 = vsyncpa [#allocation4], 1 }
 0x1dd   :  { %971 = vsyncpa [#allocation4 + $0x1], 1 }
 0x1de   :  { %972 = vsyncpa [#allocation9], 1 }
 0x1df   :  { %974 = vsyncpa [#allocation9 + $0x1], 1 }

</bundles_post_ra>
